<compile_context>
chip_gen: v7x
topology: tpu7x:2x2x1
jax: 0.10.0
libtpu: 0.0.40
codegen_flags: <defaults>
</compile_context>

<pallas_src>
import math

import jax
import jax.numpy as jnp
from jax.experimental import pallas as pl
from jax.experimental.pallas import tpu as pltpu


def _round_up(n, m):
    return ((n + m - 1) // m) * m


# --------------------------------------------------------------------------------------
# Kernel 1: fused-in-one-pass Q/K/V projection (per (batch, row-tile) grid step).
# --------------------------------------------------------------------------------------
def _qkv_proj_kernel(x_ref, wq_ref, wk_ref, wv_ref, q_ref, k_ref, v_ref):
    x = x_ref[...]                                               # (TQ, Dp), compute dtype
    q_ref[...] = jnp.dot(x, wq_ref[...],
                         preferred_element_type=jnp.float32).astype(q_ref.dtype)
    k_ref[...] = jnp.dot(x, wk_ref[...],
                         preferred_element_type=jnp.float32).astype(k_ref.dtype)
    v_ref[...] = jnp.dot(x, wv_ref[...],
                         preferred_element_type=jnp.float32).astype(v_ref.dtype)


# --------------------------------------------------------------------------------------
# Kernel 2: causal attention for one (batch, query-tile) grid step.
#   K/V blocks have a constant index over the query-tile axis, so they are only re-DMA'd
#   when the batch index changes.
# --------------------------------------------------------------------------------------
def _attention_kernel(x_ref, q_ref, k_ref, v_ref, out_ref, attn_ref,
                      s_sc, m_sc, l_sc, acc_sc):
    qi = pl.program_id(1)
    TQ, Dp = out_ref.shape                # (query tile, padded model dim)
    Sp = attn_ref.shape[1]                # padded sequence length
    nkb = Sp // TQ                        # number of key blocks (key block size == TQ)

    q = q_ref[...]                        # (TQ, Dp), compute dtype, pre-scaled by 1/sqrt(D)

    # Causal mask for the diagonal block only (local indices; past blocks are fully
    # visible, future blocks are skipped entirely).
    row = jax.lax.broadcasted_iota(jnp.int32, (TQ, TQ), 0)
    col = jax.lax.broadcasted_iota(jnp.int32, (TQ, TQ), 1)
    diag_mask = col > row

    m_sc[...] = jnp.full((TQ, 1), -1e30, jnp.float32)
    l_sc[...] = jnp.zeros((TQ, 1), jnp.float32)
    acc_sc[...] = jnp.zeros((TQ, Dp), jnp.float32)

    # ---- Pass A: scores for causally-valid key blocks (j <= qi) + row max. -------------
    for j in range(nkb):
        @pl.when(qi >= j)
        def _(j=j):
            k_blk = k_ref[j * TQ:(j + 1) * TQ, :]                        # static slice
            s = jax.lax.dot_general(
                q, k_blk, dimension_numbers=(((1,), (1,)), ((), ())),
                preferred_element_type=jnp.float32)                      # (TQ, TQ) f32
            # Mask only when this is the diagonal block.  Large finite negative (not -inf)
            # so padded rows can never produce NaN.
            s = jnp.where(jnp.logical_and(qi == j, diag_mask), -1e30, s)
            s_sc[:, j * TQ:(j + 1) * TQ] = s
            m_sc[...] = jnp.maximum(m_sc[...], jnp.max(s, axis=-1, keepdims=True))

    m = m_sc[...]                                                        # (TQ, 1)

    # ---- Pass B: exp / denominator / P @ V for valid blocks; zero-fill future blocks. --
    for j in range(nkb):
        @pl.when(qi >= j)
        def _(j=j):
            p = jnp.exp(s_sc[:, j * TQ:(j + 1) * TQ] - m)                # (TQ, TQ) f32
            s_sc[:, j * TQ:(j + 1) * TQ] = p                             # scores -> probs
            l_sc[...] = l_sc[...] + jnp.sum(p, axis=-1, keepdims=True)
            v_blk = v_ref[j * TQ:(j + 1) * TQ, :]
            acc_sc[...] = acc_sc[...] + jnp.dot(p.astype(v_blk.dtype), v_blk,
                                                preferred_element_type=jnp.float32)

        @pl.when(qi < j)
        def _(j=j):
            attn_ref[:, j * TQ:(j + 1) * TQ] = jnp.zeros((TQ, TQ), attn_ref.dtype)

    # Exact reciprocal: the probability rows are part of the returned contract.
    inv_l = pl.reciprocal(l_sc[...], approx=False)                       # (TQ, 1)

    # ---- Pass C: normalized probabilities -> attention output (each column once). ------
    for j in range(nkb):
        @pl.when(qi >= j)
        def _(j=j):
            attn_ref[:, j * TQ:(j + 1) * TQ] = (
                s_sc[:, j * TQ:(j + 1) * TQ] * inv_l).astype(attn_ref.dtype)

    # Residual add in f32 (x_ref keeps the caller's dtype).
    out_ref[...] = (x_ref[...].astype(jnp.float32)
                    + acc_sc[...] * inv_l).astype(out_ref.dtype)


# --------------------------------------------------------------------------------------
# Wrapper
# --------------------------------------------------------------------------------------
def single_head_self_attention(x, wq, wk, wv, *, q_tile=256,
                               compute_dtype=jnp.bfloat16):
    """x: (B, S, D).  wq/wk/wv: (D, D) such that Q = x @ wq (== nn.Linear.weight.T).

    Returns (out (B, S, D) in x.dtype, attn (B, S, S) f32), matching the PyTorch forward.
    MXU inputs (Q/K/V path) are cast to `compute_dtype` (bf16 by default for full-rate MXU
    on all generations); softmax, residual and the returned attention stay in f32.
    Use q_tile=128 on v7x for very long sequences (64 MiB VMEM per TensorCore).
    """
    B, S, D = x.shape

    # Lane-dense, layout-friendly padding: D -> multiple of 128; TQ multiple of 128;
    # Sp multiple of TQ (hence of 128).
    Dp = _round_up(D, 128)
    S128 = _round_up(S, 128)
    TQ = min(_round_up(max(q_tile, 128), 128), S128)
    Sp = _round_up(S, TQ)

    # Fold 1/sqrt(D) into Wq so no per-score multiply is needed in the kernel.
    scale = 1.0 / math.sqrt(float(D))
    wq_s, wk_p, wv_p = wq * scale, wk, wv
    if Dp != D:
        pad_w = ((0, Dp - D), (0, Dp - D))
        wq_s = jnp.pad(wq_s, pad_w)
        wk_p = jnp.pad(wk_p, pad_w)
        wv_p = jnp.pad(wv_p, pad_w)
    wq_c = wq_s.astype(compute_dtype)
    wk_c = wk_p.astype(compute_dtype)
    wv_c = wv_p.astype(compute_dtype)

    x_p = x
    if Sp != S or Dp != D:
        x_p = jnp.pad(x, ((0, 0), (0, Sp - S), (0, Dp - D)))
    x_c = x_p.astype(compute_dtype)           # MXU input for the projection
    # x_p (original dtype) is reused by the attention kernel for the residual add.

    cb = jnp.dtype(compute_dtype).itemsize
    xb = jnp.dtype(x.dtype).itemsize

    def _vmem_limit(nbytes):
        # ~30% headroom; floor 16 MiB, cap 100 MiB (footprints past ~64 MiB will not fit
        # v7x regardless; v5e/v6e have 128 MiB physical).
        return int(min(max(nbytes * 13 // 10, 16 * 1024 * 1024), 100 * 1024 * 1024))

    grid = (B, Sp // TQ)

    # ---------------- Q/K/V projection ----------------
    proj_foot = (2 * TQ * Dp * cb            # x tile (double-buffered)
                 + 3 * 2 * Dp * Dp * cb      # Wq/Wk/Wv (conservatively double-buffered)
                 + 3 * 2 * TQ * Dp * cb)     # Q/K/V output tiles
    q, k, v = pl.pallas_call(
        _qkv_proj_kernel,
        out_shape=tuple(jax.ShapeDtypeStruct((B, Sp, Dp), compute_dtype)
                        for _ in range(3)),
        grid_spec=pltpu.PrefetchScalarGridSpec(
            num_scalar_prefetch=0,
            grid=grid,
            in_specs=[
                pl.BlockSpec((pl.Squeezed(), TQ, Dp), lambda b, i: (b, i, 0)),
                pl.BlockSpec((Dp, Dp), lambda b, i: (0, 0)),
                pl.BlockSpec((Dp, Dp), lambda b, i: (0, 0)),
                pl.BlockSpec((Dp, Dp), lambda b, i: (0, 0)),
            ],
            out_specs=[
                pl.BlockSpec((pl.Squeezed(), TQ, Dp), lambda b, i: (b, i, 0)),
                pl.BlockSpec((pl.Squeezed(), TQ, Dp), lambda b, i: (b, i, 0)),
                pl.BlockSpec((pl.Squeezed(), TQ, Dp), lambda b, i: (b, i, 0)),
            ],
        ),
        compiler_params=pltpu.CompilerParams(
            dimension_semantics=("parallel", "parallel"),
            vmem_limit_bytes=_vmem_limit(proj_foot),
        ),
    )(x_c, wq_c, wk_c, wv_c)

    # ---------------- Causal attention ----------------
    attn_foot = (2 * TQ * Dp * xb            # x tile (residual)
                 + 2 * TQ * Dp * cb          # Q tile
                 + 2 * 2 * Sp * Dp * cb      # K and V (full padded sequence, per batch)
                 + 2 * TQ * Dp * xb          # out tile
                 + 2 * TQ * Sp * 4           # attn tile (f32)
                 + TQ * Sp * 4               # score/prob scratch
                 + TQ * Dp * 4               # acc scratch
                 + 2 * TQ * 128 * 4)         # m/l scratch (lane-padded)
    out_p, attn_p = pl.pallas_call(
        _attention_kernel,
        out_shape=(
            jax.ShapeDtypeStruct((B, Sp, Dp), x.dtype),
            jax.ShapeDtypeStruct((B, Sp, Sp), jnp.float32),
        ),
        grid_spec=pltpu.PrefetchScalarGridSpec(
            num_scalar_prefetch=0,
            grid=grid,
            in_specs=[
                pl.BlockSpec((pl.Squeezed(), TQ, Dp), lambda b, i: (b, i, 0)),  # x (residual)
                pl.BlockSpec((pl.Squeezed(), TQ, Dp), lambda b, i: (b, i, 0)),  # Q tile
                pl.BlockSpec((pl.Squeezed(), Sp, Dp), lambda b, i: (b, 0, 0)),  # K (per batch)
                pl.BlockSpec((pl.Squeezed(), Sp, Dp), lambda b, i: (b, 0, 0)),  # V (per batch)
            ],
            out_specs=[
                pl.BlockSpec((pl.Squeezed(), TQ, Dp), lambda b, i: (b, i, 0)),
                pl.BlockSpec((pl.Squeezed(), TQ, Sp), lambda b, i: (b, i, 0)),
            ],
            scratch_shapes=[
                pltpu.VMEM((TQ, Sp), jnp.float32),   # scores -> probabilities
                pltpu.VMEM((TQ, 1), jnp.float32),    # running row max
                pltpu.VMEM((TQ, 1), jnp.float32),    # softmax denominator
                pltpu.VMEM((TQ, Dp), jnp.float32),   # P @ V accumulator
            ],
        ),
        compiler_params=pltpu.CompilerParams(
            dimension_semantics=("parallel", "parallel"),
            vmem_limit_bytes=_vmem_limit(attn_foot),
        ),
    )(x_p, q, k, v)

    return out_p[:, :S, :D], attn_p[:, :S, :S]


# --------------------------------------------------------------------------------------
# Pure-JAX reference (mirrors the PyTorch forward, f32).
# --------------------------------------------------------------------------------------
def _reference(x, wq, wk, wv):
    q = x @ wq
    k = x @ wk
    v = x @ wv
    d = x.shape[-1]
    scores = jnp.einsum("bsd,btd->bst", q, k) / jnp.sqrt(jnp.float32(d))
    s = x.shape[1]
    mask = jnp.triu(jnp.ones((s, s), dtype=bool), k=1)
    scores = jnp.where(mask[None], -jnp.inf, scores)
    attn = jax.nn.softmax(scores, axis=-1)
    return x + jnp.einsum("bst,btd->bsd", attn, v), attn


if __name__ == "__main__":
    # Small demo shapes (module's d_model=512 scaled down to 128).  S=320 with the default
    # TQ=256 exercises: two query tiles, the causal key-block skip, the diagonal-block
    # mask, sequence padding (Sp=512), and the zero-fill of strictly-future attn columns.
    B, S, D = 2, 320, 128

    key = jax.random.PRNGKey(0)
    kx, kq, kk, kv = jax.random.split(key, 4)

    x = jax.random.normal(kx, (B, S, D), dtype=jnp.float32)
    lim = 1.0 / math.sqrt(D)   # roughly nn.Linear's default init scale
    wq = jax.random.uniform(kq, (D, D), jnp.float32, -lim, lim)
    wk = jax.random.uniform(kk, (D, D), jnp.float32, -lim, lim)
    wv = jax.random.uniform(kv, (D, D), jnp.float32, -lim, lim)

    out, attn = single_head_self_attention(x, wq, wk, wv)
    out = jax.block_until_ready(out)
    attn = jax.block_until_ready(attn)

    ref_out, ref_attn = _reference(x, wq, wk, wv)
    # Tolerances account for the default bf16 MXU inputs (softmax/residual stay f32).
    assert jnp.all(jnp.isfinite(out)) and jnp.all(jnp.isfinite(attn)), "non-finite output"
    assert jnp.allclose(out, ref_out, atol=2e-2, rtol=2e-2), "out mismatch"
    assert jnp.allclose(attn, ref_attn, atol=1e-2, rtol=1e-2), "attn mismatch"

    print("KERNEL_OK")
</pallas_src>

<mosaic_0001>
module attributes {stable_mosaic.version = 11 : i64} {
  func.func @_qkv_proj_kernel(%arg0: i32, %arg1: i32, %arg2: memref<1x256x128xbf16, #tpu.memory_space<vmem>>, %arg3: memref<128x128xbf16, #tpu.memory_space<vmem>>, %arg4: memref<128x128xbf16, #tpu.memory_space<vmem>>, %arg5: memref<128x128xbf16, #tpu.memory_space<vmem>>, %arg6: memref<1x256x128xbf16, #tpu.memory_space<vmem>>, %arg7: memref<1x256x128xbf16, #tpu.memory_space<vmem>>, %arg8: memref<1x256x128xbf16, #tpu.memory_space<vmem>>) attributes {dimension_semantics = [#tpu.dimension_semantics<parallel>, #tpu.dimension_semantics<parallel>], iteration_bounds = array<i64: 2, 2>, scalar_prefetch = 0 : i64, scratch_operands = 0 : i64, tpu.core_type = #tpu.core_type<tc>, window_params = [{transform_indices = @transform_0, window_bounds = array<i64: 1, 256, 128>}, {pipeline_mode = #tpu.pipeline_mode<synchronous>, transform_indices = @transform_1, window_bounds = array<i64: 128, 128>}, {pipeline_mode = #tpu.pipeline_mode<synchronous>, transform_indices = @transform_2, window_bounds = array<i64: 128, 128>}, {pipeline_mode = #tpu.pipeline_mode<synchronous>, transform_indices = @transform_3, window_bounds = array<i64: 128, 128>}, {transform_indices = @transform_4, window_bounds = array<i64: 1, 256, 128>}, {transform_indices = @transform_5, window_bounds = array<i64: 1, 256, 128>}, {transform_indices = @transform_6, window_bounds = array<i64: 1, 256, 128>}]} {
    %c0 = arith.constant 0 : index
    %c0_0 = arith.constant 0 : index
    %c0_1 = arith.constant 0 : index
    %0 = vector.load %arg2[%c0, %c0_0, %c0_1] : memref<1x256x128xbf16, #tpu.memory_space<vmem>>, vector<1x256x128xbf16>
    %1 = vector.shape_cast %0 : vector<1x256x128xbf16> to vector<256x128xbf16>
    %c0_2 = arith.constant 0 : index
    %c0_3 = arith.constant 0 : index
    %2 = vector.load %arg3[%c0_2, %c0_3] : memref<128x128xbf16, #tpu.memory_space<vmem>>, vector<128x128xbf16>
    %cst = arith.constant dense<0.000000e+00> : vector<256x128xf32>
    %3 = tpu.matmul %1, %2, %cst {dimension_numbers = #tpu.dot_dimension_numbers<[1], [0], [0], [1], [0, 0, 1, 1], [], []>} : vector<256x128xbf16>, vector<128x128xbf16>, vector<256x128xf32> -> vector<256x128xf32>
    %4 = arith.truncf %3 : vector<256x128xf32> to vector<256x128xbf16>
    %c0_4 = arith.constant 0 : index
    %c0_5 = arith.constant 0 : index
    %c0_6 = arith.constant 0 : index
    %5 = vector.load %arg6[%c0_4, %c0_5, %c0_6] : memref<1x256x128xbf16, #tpu.memory_space<vmem>>, vector<1x256x128xbf16>
    %6 = vector.shape_cast %5 : vector<1x256x128xbf16> to vector<256x128xbf16>
    %7 = vector.shape_cast %4 : vector<256x128xbf16> to vector<1x256x128xbf16>
    tpu.vector_store %arg6[%c0_4, %c0_5, %c0_6], %7 {strides = array<i32>} : memref<1x256x128xbf16, #tpu.memory_space<vmem>>, vector<1x256x128xbf16>,
    %c0_7 = arith.constant 0 : index
    %c0_8 = arith.constant 0 : index
    %8 = vector.load %arg4[%c0_7, %c0_8] : memref<128x128xbf16, #tpu.memory_space<vmem>>, vector<128x128xbf16>
    %cst_9 = arith.constant dense<0.000000e+00> : vector<256x128xf32>
    %9 = tpu.matmul %1, %8, %cst_9 {dimension_numbers = #tpu.dot_dimension_numbers<[1], [0], [0], [1], [0, 0, 1, 1], [], []>} : vector<256x128xbf16>, vector<128x128xbf16>, vector<256x128xf32> -> vector<256x128xf32>
    %10 = arith.truncf %9 : vector<256x128xf32> to vector<256x128xbf16>
    %c0_10 = arith.constant 0 : index
    %c0_11 = arith.constant 0 : index
    %c0_12 = arith.constant 0 : index
    %11 = vector.load %arg7[%c0_10, %c0_11, %c0_12] : memref<1x256x128xbf16, #tpu.memory_space<vmem>>, vector<1x256x128xbf16>
    %12 = vector.shape_cast %11 : vector<1x256x128xbf16> to vector<256x128xbf16>
    %13 = vector.shape_cast %10 : vector<256x128xbf16> to vector<1x256x128xbf16>
    tpu.vector_store %arg7[%c0_10, %c0_11, %c0_12], %13 {strides = array<i32>} : memref<1x256x128xbf16, #tpu.memory_space<vmem>>, vector<1x256x128xbf16>,
    %c0_13 = arith.constant 0 : index
    %c0_14 = arith.constant 0 : index
    %14 = vector.load %arg5[%c0_13, %c0_14] : memref<128x128xbf16, #tpu.memory_space<vmem>>, vector<128x128xbf16>
    %cst_15 = arith.constant dense<0.000000e+00> : vector<256x128xf32>
    %15 = tpu.matmul %1, %14, %cst_15 {dimension_numbers = #tpu.dot_dimension_numbers<[1], [0], [0], [1], [0, 0, 1, 1], [], []>} : vector<256x128xbf16>, vector<128x128xbf16>, vector<256x128xf32> -> vector<256x128xf32>
    %16 = arith.truncf %15 : vector<256x128xf32> to vector<256x128xbf16>
    %c0_16 = arith.constant 0 : index
    %c0_17 = arith.constant 0 : index
    %c0_18 = arith.constant 0 : index
    %17 = vector.load %arg8[%c0_16, %c0_17, %c0_18] : memref<1x256x128xbf16, #tpu.memory_space<vmem>>, vector<1x256x128xbf16>
    %18 = vector.shape_cast %17 : vector<1x256x128xbf16> to vector<256x128xbf16>
    %19 = vector.shape_cast %16 : vector<256x128xbf16> to vector<1x256x128xbf16>
    tpu.vector_store %arg8[%c0_16, %c0_17, %c0_18], %19 {strides = array<i32>} : memref<1x256x128xbf16, #tpu.memory_space<vmem>>, vector<1x256x128xbf16>,
    return
  }
  func.func @transform_0(%arg0: i32, %arg1: i32) -> (i32, i32, i32) {
    %c0_i32 = arith.constant 0 : i32
    %c0_i32_0 = arith.constant 0 : i32
    return %arg0, %arg1, %c0_i32 : i32, i32, i32
  }
  func.func @transform_1(%arg0: i32, %arg1: i32) -> (i32, i32) {
    %c0_i32 = arith.constant 0 : i32
    %c0_i32_0 = arith.constant 0 : i32
    %c0_i32_1 = arith.constant 0 : i32
    return %c0_i32, %c0_i32_0 : i32, i32
  }
  func.func @transform_2(%arg0: i32, %arg1: i32) -> (i32, i32) {
    %c0_i32 = arith.constant 0 : i32
    %c0_i32_0 = arith.constant 0 : i32
    %c0_i32_1 = arith.constant 0 : i32
    return %c0_i32, %c0_i32_0 : i32, i32
  }
  func.func @transform_3(%arg0: i32, %arg1: i32) -> (i32, i32) {
    %c0_i32 = arith.constant 0 : i32
    %c0_i32_0 = arith.constant 0 : i32
    %c0_i32_1 = arith.constant 0 : i32
    return %c0_i32, %c0_i32_0 : i32, i32
  }
  func.func @transform_4(%arg0: i32, %arg1: i32) -> (i32, i32, i32) {
    %c0_i32 = arith.constant 0 : i32
    %c0_i32_0 = arith.constant 0 : i32
    return %arg0, %arg1, %c0_i32 : i32, i32, i32
  }
  func.func @transform_5(%arg0: i32, %arg1: i32) -> (i32, i32, i32) {
    %c0_i32 = arith.constant 0 : i32
    %c0_i32_0 = arith.constant 0 : i32
    return %arg0, %arg1, %c0_i32 : i32, i32, i32
  }
  func.func @transform_6(%arg0: i32, %arg1: i32) -> (i32, i32, i32) {
    %c0_i32 = arith.constant 0 : i32
    %c0_i32_0 = arith.constant 0 : i32
    return %arg0, %arg1, %c0_i32 : i32, i32, i32
  }
}

</mosaic_0001>

<bundles_post_ra>
// kernel: tpu_custom_call.1
= control target key start
LH: loop header
LB: loop body
LE: loop exit
PB: predicated region body
PF: predicated region fallthrough
CT: control target
= control target key end

     0   :  { %s3679_s0 = inlined_call_operand.hbm [shape: bf16[2,512,128], index: 0, kind: input, shape index: {}]   ;;  %s3680_s1 = inlined_call_operand.hbm [shape: bf16[128,128], index: 1, kind: input, shape index: {}]   ;;  %s3681_s2 = inlined_call_operand.hbm [shape: bf16[128,128], index: 2, kind: input, shape index: {}]   ;;  %s3682_s3 = inlined_call_operand.hbm [shape: bf16[128,128], index: 3, kind: input, shape index: {}]   ;;  %s3683_s4 = inlined_call_operand.hbm [shape: bf16[2,512,128], index: 4, kind: output, shape index: {0}]   ;;  %s3684_s5 = inlined_call_operand.hbm [shape: bf16[2,512,128], index: 5, kind: output, shape index: {1}]   ;;  %s3685_s6 = inlined_call_operand.hbm [shape: bf16[2,512,128], index: 6, kind: output, shape index: {2}]  }
   0x1   :  { %3697 = sst [smem:[#allocation22_spill]] %s3680_s1 }
   0x2   :  { %3698 = sst [smem:[#allocation23_spill]] %s3681_s2 }
   0x3   :  { %3699 = sst [smem:[#allocation24_spill]] %s3682_s3 }
   0x4   :  { %3700 = sst [smem:[#allocation25_spill]] %s3684_s5 }
   0x5   :  { %3701 = sst [smem:[#allocation26_spill]] %s3685_s6 }
   0x6   :  { %12 = vsyncpa [#allocation3], 0 }
   0x7   :  { %14 = vsyncpa [#allocation3 + $0x1], 0 }
   0x8   :  { %15 = vsyncpa [#allocation6], 0 }
   0x9   :  { %16 = vsyncpa [#allocation9], 0 }
   0xa   :  { %17 = vsyncpa [#allocation4], 0 }
   0xb   :  { %19 = vsyncpa [#allocation4 + $0x1], 0 }
   0xc   :  { %20 = vsyncpa [#allocation12], 0 }
   0xd   :  { %22 = vsyncpa [#allocation12 + $0x1], 0  ;;  %s3163_s21 = smov 0   ;;  %s3165_s22 = smov 0  }
   0xe   :  { %s3167_s23 = smov 0   ;;  %s3169_s24 = smov 0  }
   0xf   :  { %s3171_s25 = smov 0   ;;  %s3173_s26 = smov 0  }
  0x10   :  { %s3175_s27 = smov 0   ;;  %s3177_s28 = smov 0  }
  0x11 LB: > { %3702 = sst [smem:[#allocation19_spill]] %s3087_s21  ;;  %s3204_s29 = sadd.s32 4294967295, %s3115_s28   ;;  %s3115_s28 = sphi %s3177_s28, %s28_s28   ;;  %s3111_s27 = sphi %s3175_s27, %s3738_s27   ;;  %s3107_s26 = sphi %s3173_s26, %s3737_s26   ;;  %s3103_s25 = sphi %s3171_s25, %s3736_s25   ;;  %s3099_s24 = sphi %s3169_s24, %s3735_s24   ;;  %s3095_s23 = sphi %s3167_s23, %s3734_s23   ;;  %s3091_s22 = sphi %s3165_s22, %s3733_s22   ;;  %s3087_s21 = sphi %s3163_s21, %s3732_s21  }
  0x12   : > { %s3686_s30 = sadd.s32 4294967294, %s3115_s28   ;;  %p62_p0 = scmp.ne.s32.totalorder %s3091_s22, %s3087_s21 }
  0x13   : > { %p3687_p1 = scmp.eq.s32.totalorder %s3204_s29, 0  ;;  %p157_p3 = scmp.eq.s32.totalorder %s3686_s30, 3 }
  0x14   : > { %p1892_p5 = scmp.ge.s32.totalorder %s3115_s28, 1  ;;  %p220_p7 = scmp.lt.s32.totalorder %s3115_s28, 5 }
  0x15   : > { %p3215_p4 = por %p3687_p1, %p62_p0  ;;  %p3220_p6 = por %p157_p3, %p62_p0 }
  0x16   : > { %p3225_p8 = pnand %p1892_p5, %p220_p7  ;;  %s3117_s10 = smov [#allocation5]  }
  0x17   : > { %s3703_s7 = scalar_select %p3215_p4, 1, 0 }
  0x18   : > { %s3704_s8 = scalar_select %p3220_p6, 1, 0 }
  0x19   : > { %s3706_s9 = scalar_select %p3225_p8, 1, 0 }
  0x1a   : > { %3705 = sst [smem:[#allocation20_spill]] %s3704_s8  ;;  %s232_s11 = sshll.u32 %s3117_s10, 4  ;;  %s3229_s11 = int_to_ptr.vmem [resolvable:$true] %s232_s11 }
  0x1b   : > { %p2692_p9 = pneg %p3225_p8  ;;  %s3118_s13 = smov [#allocation7]  }
  0x1c   : > { %s245_s14 = sshll.u32 %s3118_s13, 4  ;;  %s3119_s15 = smov [#allocation8]   ;;  %s3239_s14 = int_to_ptr.vmem [resolvable:$true] %s245_s14 }
  0x1d   : > { %p3235_p10 = pnand %p2692_p9, %p3687_p1  ;;  %s3241_s16 = sshll.u32 %s3119_s15, 4  ;;  %s259_s16 = int_to_ptr.vmem [resolvable:$true] %s3241_s16 }
  0x1e   : > { %s3708_s1 = sld [smem:[#allocation22_spill]] }
  0x1f   : > { %p3251_p12 = pneg %p3235_p10 }
  0x24   : > { %s2835_s19 = scalar_lea.hbm %s3708_s1, 1024 }
  0x25   : > { %p2836_p11 = scmp.ne.s32.totalorder %s3708_s1, %s2835_s19  ;;  %p2842_p3 = scmp.lt.u32.totalorder %s2835_s19, %s3708_s1 }
  0x27   : > { %p2838_p13 = pnand %p3251_p12, %p2836_p11 }
  0x29   : > { %p2839_p0 = pneg %p2838_p13 }
  0x2b   : > { %p2844_p5 = pnand %p2842_p3, %p2839_p0 }
  0x2d   : > { %2847 = shalt.err (!%p2844_p5)
}
  0x2e   : > { %s2848_s17 = scalar_lea.vmem %s3229_s11, 1024  ;;  %p2856_p2 = scmp.lt.s32.totalorder %s3229_s11, %s3229_s11 }
  0x2f   : > { %p2849_p7 = scmp.ne.s32.totalorder %s3229_s11, %s2848_s17  ;;  %p2857_p6 = scmp.lt.s32.totalorder %s2848_s17, %s2848_s17 }
  0x31   : > { %p2851_p9 = pnand %p2849_p7, %p3251_p12  ;;  %p2858_p11 = por %p2857_p6, %p2856_p2 }
  0x33   : > { %p2852_p1 = pneg %p2851_p9 }
  0x35   : > { %p2859_p13 = pnand %p2858_p11, %p2852_p1 }
  0x37   : > { %2862 = shalt.err (!%p2859_p13)
}
  0x38   : > { %s3694_s18 = smov 64   ;;  %s3695_s19 = smov 4  }
  0x39   : > { %2695 = dma.hbm_to_vmem [thread:$0]  (!%p3235_p10), %s3708_s1, 1024, %s3229_s11, [#allocation6], %s3694_s18, %s3694_s18, %s3695_s19  }
  0x3a   : > { %s3710_s2 = sld [smem:[#allocation23_spill]] }
  0x40   : > { %s2863_s17 = scalar_lea.hbm %s3710_s2, 1024 }
  0x41   : > { %p2864_p1 = scmp.ne.s32.totalorder %s3710_s2, %s2863_s17  ;;  %p2870_p0 = scmp.lt.u32.totalorder %s2863_s17, %s3710_s2 }
  0x43   : > { %p2866_p2 = pnand %p2864_p1, %p3251_p12 }
  0x45   : > { %p2867_p6 = pneg %p2866_p2 }
  0x47   : > { %p2872_p3 = pnand %p2870_p0, %p2867_p6 }
  0x49   : > { %2875 = shalt.err (!%p2872_p3)
}
  0x4a   : > { %s2876_s11 = scalar_lea.vmem %s3239_s14, 1024  ;;  %p2884_p11 = scmp.lt.s32.totalorder %s3239_s14, %s3239_s14 }
  0x4b   : > { %p2877_p5 = scmp.ne.s32.totalorder %s3239_s14, %s2876_s11  ;;  %p2885_p13 = scmp.lt.s32.totalorder %s2876_s11, %s2876_s11 }
  0x4d   : > { %p2879_p7 = pnand %p2877_p5, %p3251_p12  ;;  %p2886_p1 = por %p2885_p13, %p2884_p11 }
  0x4f   : > { %p2880_p9 = pneg %p2879_p7 }
  0x51   : > { %p2887_p2 = pnand %p2886_p1, %p2880_p9 }
  0x53   : > { %2890 = shalt.err (!%p2887_p2)
}
  0x54   : > { %2698 = dma.hbm_to_vmem [thread:$0]  (!%p3235_p10), %s3710_s2, 1024, %s3239_s14, [#allocation6], %s3694_s18, %s3694_s18, %s3695_s19  }
  0x55   : > { %s3711_s3 = sld [smem:[#allocation24_spill]] }
  0x5b   : > { %s2891_s20 = scalar_lea.hbm %s3711_s3, 1024 }
  0x5c   : > { %p2892_p6 = scmp.ne.s32.totalorder %s3711_s3, %s2891_s20  ;;  %p2898_p5 = scmp.lt.u32.totalorder %s2891_s20, %s3711_s3 }
  0x5e   : > { %p2894_p0 = pnand %p2892_p6, %p3251_p12 }
  0x60   : > { %p2895_p3 = pneg %p2894_p0 }
  0x62   : > { %p2900_p7 = pnand %p2898_p5, %p2895_p3 }
  0x64   : > { %2903 = shalt.err (!%p2900_p7)
}
  0x65   : > { %s2904_s11 = scalar_lea.vmem %s259_s16, 1024  ;;  %p2912_p1 = scmp.lt.s32.totalorder %s259_s16, %s259_s16 }
  0x66   : > { %p2905_p9 = scmp.ne.s32.totalorder %s259_s16, %s2904_s11  ;;  %p2913_p2 = scmp.lt.s32.totalorder %s2904_s11, %s2904_s11 }
  0x68   : > { %p2907_p11 = pnand %p2905_p9, %p3251_p12  ;;  %p2914_p4 = por %p2913_p2, %p2912_p1 }
  0x6a   : > { %p2908_p13 = pneg %p2907_p11 }
  0x6c   : > { %p2915_p8 = pnand %p2914_p4, %p2908_p13 }
  0x6e   : > { %2918 = shalt.err (!%p2915_p8)
}
  0x6f   : > { %2701 = dma.hbm_to_vmem [thread:$0]  (!%p3235_p10), %s3711_s3, 1024, %s259_s16, [#allocation9], %s3694_s18, %s3694_s18, %s3695_s19  }
  0x70   : > { %s37_s30 = sadd.s32 1, %s3107_s26  ;;  %s40_s12 = sadd.s32 1, %s3111_s27 }
  0x71   : > { %p38_p4 = scmp.ge.s32.totalorder %s37_s30, 2  ;;  %s49_s6 = sadd.s32 1, %s3095_s23 }
  0x72   : > { %p56_p8 = scmp.ne.s32.totalorder %s3095_s23, %s3091_s22  ;;  %p57_p12 = scmp.eq.s32.totalorder %s3115_s28, 0 }
  0x73   : > { %s3740_s30 = smov (%p38_p4, %s37_s30), 0  ;;  %s3742_s12 = smov (!%p38_p4, %s40_s12), %s3111_s27 }
  0x74   : > { %s45_s21 = ssub.s32 %s3107_s26, %s3740_s30  ;;  %p42_p6 = scmp.ge.s32.totalorder %s3742_s12, 2 }
  0x75   : > { %p3712_p0 = scmp.eq.s32.totalorder %s3204_s29, 3  ;;  %p3340_p10 = por %p57_p12, %p56_p8 }
  0x76   : > { %p2719_p5 = scmp.lt.s32.totalorder %s3115_s28, 4  ;;  %s3744_s12 = smov (%p42_p6, %s3742_s12), 0 }
  0x77   : > { %p3336_p3 = por %p3712_p0, %p56_p8  ;;  %3715 = sst [smem:[#allocation21_spill]] %s3744_s12 }
  0x78   : > { %s272_s20 = sand.u32 1, %s3095_s23   ;;  %s1898_s10 = sshll.u32 %s3107_s26, 5 }
  0x79   : > { %s44_s13 = ssub.s32 %s3111_s27, %s3744_s12  ;;  %s1897_s17 = sshll.u32 %s272_s20, 7 }
  0x7a   : > { %s46_s15 = sor.u32 %s45_s21, %s44_s13  ;;  %s1899_s11 = sshll.u32 %s3111_s27, 6 }
  0x7b   : > { %p47_p7 = scmp.eq.s32.totalorder %s46_s15, 0  ;;  %s276_s14 = scalar_lea.vmem [#allocation2], %s1897_s17 }
  0x7c   : > { %s285_s5 = sshll.u32 %s276_s14, 4  ;;  %s282_s19 = sadd.s32 %s1899_s11, %s1898_s10  ;;  %s3355_s5 = int_to_ptr.vmem [resolvable:$true] %s285_s5 }
  0x7d   : > { %s3353_s18 = scalar_select %p47_p7, %s3095_s23, %s49_s6  }
  0x7e   : > { %s1900_s1 = sshll.u32 %s282_s19, 6  ;;  %p3361_p9 = pnand %p2719_p5, %p3340_p10 }
  0x7f   : > { %s3368_s21 = scalar_lea.hbm %s3679_s0, %s1900_s1  ;;  %s3370_s6 = scalar_lea.sflag [#allocation3], %s272_s20 }
  0x80   : > { %s2919_s19 = scalar_lea.hbm %s3368_s21, 2048  ;;  %p2921_p13 = pneg %p3361_p9 }
  0x81   : > { %p2920_p11 = scmp.ne.s32.totalorder %s3368_s21, %s2919_s19  ;;  %s2924_s12 = scalar_lea.hbm %s3679_s0, 8192 }
  0x82   : > { %p2925_p4 = scmp.lt.u32.totalorder %s3368_s21, %s3679_s0  ;;  %p2926_p8 = scmp.lt.u32.totalorder %s2924_s12, %s2919_s19 }
  0x83   : > { %p2922_p1 = pnand %p2921_p13, %p2920_p11  ;;  %p2928_p6 = scmp.lt.u32.totalorder %s2919_s19, %s3368_s21 }
  0x84   : > { %p2927_p12 = por %p2926_p8, %p2925_p4 }
  0x85   : > { %p2923_p2 = pneg %p2922_p1 }
  0x86   : > { %p2929_p0 = por %p2928_p6, %p2927_p12 }
  0x88   : > { %p2930_p10 = pnand %p2929_p0, %p2923_p2 }
  0x8a   : > { %2933 = shalt.err (!%p2930_p10)
}
  0x8b   : > { %s2934_s20 = scalar_lea.vmem %s3355_s5, 2048  ;;  %s3122_s13 = smov [#allocation2]  }
  0x8c   : > { %p2935_p5 = scmp.ne.s32.totalorder %s3355_s5, %s2934_s20  ;;  %s2939_s15 = sshll.u32 %s3122_s13, 4  ;;  %s2940_s15 = int_to_ptr.vmem [resolvable:$false] %s2939_s15 }
  0x8d   : > { %s2941_s17 = scalar_lea.vmem %s2940_s15, 4096  ;;  %p2942_p1 = scmp.lt.s32.totalorder %s3355_s5, %s2940_s15 }
  0x8e   : > { %p2937_p7 = pnand %p2935_p5, %p2921_p13  ;;  %p2943_p4 = scmp.lt.s32.totalorder %s2941_s17, %s2934_s20 }
  0x90   : > { %p2938_p11 = pneg %p2937_p7  ;;  %p2944_p8 = por %p2943_p4, %p2942_p1 }
  0x92   : > { %p2945_p12 = pnand %p2944_p8, %p2938_p11 }
  0x94   : > { %2948 = shalt.err (!%p2945_p12)
}
  0x95   : > { %s3717_s11 = smov 4   ;;  %s3718_s14 = smov 64  }
  0x96   : > { %2705 = dma.hbm_to_vmem [thread:$0]  (!%p3361_p9), %s3368_s21, 2048, %s3355_s5, %s3370_s6, %s3718_s14, %s3718_s14, %s3717_s11  }
  0x97   : > { %p3719_p13 = scmp.ne.s32.totalorder %s3706_s9, 0 }
  0x98   : > { %s3404_s19 = sand.u32 (!%p3719_p13), 1, %s3091_s22   ;;  %p3720_p2 = scmp.ne.s32.totalorder (!%p3719_p13), %s3703_s7, 0 }
  0x99   : > { %297 = sbr.rel (%p3719_p13) target bundleno = 542 (0x21e), region = 36  ;;  %s3407_s16 = sshll.u32 (!%p3719_p13), %s3404_s19, 7 }
  0x9a   : > { %s300_s2 = scalar_lea.sflag (!%p3719_p13), [#allocation3], %s3404_s19  ;;  %s3411_s3 = scalar_lea.vmem (!%p3719_p13), [#allocation2], %s3407_s16 }
  0xa0   : > { %3066 = dma.done.wait (%p3720_p2), %s300_s2, 2048  }
  0xa1   : > { %3068 = vsyncadd (%p3720_p2), %s300_s2, 4294965248  ;;  %p3721_p9 = scmp.eq.s32.totalorder %s3204_s29, 0 }
  0xa3   : > { %3070 = dma.done.wait (%p3721_p9), [#allocation6], 2048   ;;  %p3722_p6 = pmov %p3721_p9 }
  0xa5   : > { %3072 = vsyncadd (%p3722_p6), [#allocation6], 4294965248  ;;  %p3723_p0 = pmov %p3722_p6 }
  0xa7   : > { %3074 = dma.done.wait (%p3723_p0), [#allocation9], 1024   ;;  %p3724_p10 = pmov %p3723_p0 }
  0xa8   : > { %v2795_v0 = vld [vmem:[#allocation5] sm:$0xff]   ;;  %v2796_v1 = vld [vmem:[#allocation5 + $0x8] sm:$0xff]   ;;  %v2797_v2 = vld [vmem:[#allocation5 + $0x10] sm:$0xff]   ;;  %s3482_s7 = scalar_lea.vmem [#allocation10], %s3407_s16  ;;  %s2048_s9 = sshll.u32 %s3099_s24, 5 }
  0xa9   : > { %3076 = vsyncadd (%p3724_p10), [#allocation9], 4294966272  ;;  %2512 = vmatprep.subr.bf16.mxu0 %v2795_v0  ;;  %2656 = vmatprep.subr.bf16.mxu1 %v2795_v0  ;;  %v2798_v3 = vld [vmem:[#allocation5 + $0x18] sm:$0xff]   ;;  %v3426_v4 = vld [vmem:[%s3411_s3] sm:$0xff]   ;;  %s2049_s5 = sshll.u32 %s3103_s25, 6  ;;  %s1668_s24 = sshll.u32 %s3482_s7, 4  ;;  %s3507_s24 = int_to_ptr.vmem [resolvable:$true] %s1668_s24 }
  0xaa   : > { %2513 = vmatpush3.bf16.msra.mxu0 %v2795_v0  ;;  %2664 = vmatpush3.bf16.msra.mxu1 %v2795_v0  ;;  %v3429_v5 = vld [vmem:[%s3411_s3 + $0x40] sm:$0xff]   ;;  %v2800_v7 = vld [vmem:[#allocation5 + $0x28] sm:$0xff]   ;;  %v2801_v8 = vld [vmem:[#allocation5 + $0x30] sm:$0xff]   ;;  %s1665_s21 = sadd.s32 %s2049_s5, %s2048_s9  ;;  %s1643_s10 = scalar_lea.sflag [#allocation4], %s3404_s19 }
  0xab   : > { %2514 = vmatprep.subr.bf16.mxu0 %v2796_v1  ;;  %2657 = vmatprep.subr.bf16.mxu1 %v2796_v1  ;;  %v2799_v6 = vld [vmem:[#allocation5 + $0x20] sm:$0xff]   ;;  %v2802_v9 = vld [vmem:[#allocation5 + $0x38] sm:$0xff]   ;;  %v3434_v11 = vld [vmem:[%s3411_s3 + $0x8] sm:$0xff]   ;;  %s3498_s6 = sshll.u32 %s1665_s21, 6  ;;  %s2949_s20 = scalar_lea.vmem %s3507_s24, 2048 }
  0xac   : > { %2528 = vmatprep.mubr.bf16.mxu0 %v3426_v4  ;;  %2544 = vmatprep.mubr.bf16.mxu1 %v3429_v5  ;;  %v2807_v10 = vld [vmem:[#allocation7] sm:$0xff]   ;;  %v3437_v13 = vld [vmem:[%s3411_s3 + $0x48] sm:$0xff]   ;;  %v3440_v16 = vld [vmem:[%s3411_s3 + $0x10] sm:$0xff]   ;;  %s3505_s1 = scalar_lea.hbm %s3683_s4, %s3498_s6  ;;  %p2950_p5 = scmp.ne.s32.totalorder %s3507_s24, %s2949_s20 }
  0xad   : > { %v2808_v12 = vld [vmem:[#allocation8] sm:$0xff]   ;;  %v2809_v14 = vld [vmem:[#allocation7 + $0x8] sm:$0xff]   ;;  %v3443_v17 = vld [vmem:[%s3411_s3 + $0x50] sm:$0xff]   ;;  %s3123_s13 = smov [#allocation10]  }
  0xae   : > { %2515 = vmatpush3.bf16.msra.mxu0 %v2796_v1  ;;  %2665 = vmatpush3.bf16.msra.mxu1 %v2796_v1  ;;  %v2810_v15 = vld [vmem:[#allocation8 + $0x8] sm:$0xff]   ;;  %v2815_v18 = vld [vmem:[#allocation7 + $0x10] sm:$0xff]   ;;  %v2813_v20 = vld [vmem:[%s3411_s3 + $0x18] sm:$0xff]   ;;  %p2951_p7 = pnand %p2950_p5, %p3336_p3  ;;  %s2953_s15 = sshll.u32 %s3123_s13, 4  ;;  %s2954_s15 = int_to_ptr.vmem [resolvable:$false] %s2953_s15 }
  0xaf   : > { %2516 = vmatprep.subr.bf16.mxu0 %v2797_v2  ;;  %2658 = vmatprep.subr.bf16.mxu1 %v2797_v2  ;;  %v2816_v19 = vld [vmem:[#allocation8 + $0x10] sm:$0xff]   ;;  %v3451_v21 = vld [vmem:[%s3411_s3 + $0x58] sm:$0xff]   ;;  %v2819_v24 = vld [vmem:[%s3411_s3 + $0x20] sm:$0xff]   ;;  %s2955_s17 = scalar_lea.vmem %s2954_s15, 4096  ;;  %p2956_p1 = scmp.lt.s32.totalorder %s3507_s24, %s2954_s15 }
  0xb0   : > { %v2817_v22 = vld [vmem:[#allocation7 + $0x18] sm:$0xff]   ;;  %v3455_v25 = vld [vmem:[%s3411_s3 + $0x60] sm:$0xff]   ;;  %v2821_v28 = vld [vmem:[%s3411_s3 + $0x28] sm:$0xff]   ;;  %p2952_p11 = pneg %p2951_p7  ;;  %p2957_p4 = scmp.lt.s32.totalorder %s2955_s17, %s2949_s20 }
  0xb1   : > { %v2818_v23 = vld [vmem:[#allocation8 + $0x18] sm:$0xff]   ;;  %v2823_v26 = vld [vmem:[#allocation7 + $0x20] sm:$0xff]   ;;  %v2822_v29 = vld [vmem:[%s3411_s3 + $0x68] sm:$0xff]  }
  0xb2   : > { %2517 = vmatpush3.bf16.msra.mxu0 %v2797_v2  ;;  %2666 = vmatpush3.bf16.msra.mxu1 %v2797_v2  ;;  %v2824_v27 = vld [vmem:[#allocation8 + $0x20] sm:$0xff]   ;;  %v2825_v30 = vld [vmem:[#allocation7 + $0x28] sm:$0xff]   ;;  %v2827_v32 = vld [vmem:[%s3411_s3 + $0x30] sm:$0xff]   ;;  %p2958_p8 = por %p2957_p4, %p2956_p1 }
  0xb3   : > { %2518 = vmatprep.subr.bf16.mxu0 %v2798_v3  ;;  %2659 = vmatprep.subr.bf16.mxu1 %v2798_v3  ;;  %v2826_v31 = vld [vmem:[#allocation8 + $0x28] sm:$0xff]   ;;  %v2828_v33 = vld [vmem:[%s3411_s3 + $0x70] sm:$0xff]   ;;  %v2829_v36 = vld [vmem:[%s3411_s3 + $0x38] sm:$0xff]  }
  0xb4   : > { %v2831_v34 = vld [vmem:[#allocation7 + $0x30] sm:$0xff]   ;;  %v2830_v37 = vld [vmem:[%s3411_s3 + $0x78] sm:$0xff]   ;;  %p2959_p12 = pnand %p2958_p8, %p2952_p11 }
  0xb5   : > { %v2832_v35 = vld [vmem:[#allocation8 + $0x30] sm:$0xff]   ;;  %v2833_v38 = vld [vmem:[#allocation7 + $0x38] sm:$0xff]  }
  0xb6   : > { %2519 = vmatpush3.bf16.msra.mxu0 %v2798_v3  ;;  %2667 = vmatpush3.bf16.msra.mxu1 %v2798_v3  ;;  %v2834_v39 = vld [vmem:[#allocation8 + $0x38] sm:$0xff]  }
  0xb7   : > { %2520 = vmatprep.subr.bf16.mxu0 %v2799_v6  ;;  %2660 = vmatprep.subr.bf16.mxu1 %v2799_v6 }
  0xba   : > { %2521 = vmatpush3.bf16.msra.mxu0 %v2799_v6  ;;  %2668 = vmatpush3.bf16.msra.mxu1 %v2799_v6 }
  0xbb   : > { %2522 = vmatprep.subr.bf16.mxu0 %v2800_v7  ;;  %2661 = vmatprep.subr.bf16.mxu1 %v2800_v7 }
  0xbe   : > { %2523 = vmatpush3.bf16.msra.mxu0 %v2800_v7  ;;  %2669 = vmatpush3.bf16.msra.mxu1 %v2800_v7 }
  0xbf   : > { %2524 = vmatprep.subr.bf16.mxu0 %v2801_v8  ;;  %2662 = vmatprep.subr.bf16.mxu1 %v2801_v8 }
  0xc2   : > { %2525 = vmatpush3.bf16.msra.mxu0 %v2801_v8  ;;  %2670 = vmatpush3.bf16.msra.mxu1 %v2801_v8 }
  0xc3   : > { %2526 = vmatprep.subr.bf16.mxu0 %v2802_v9  ;;  %2663 = vmatprep.subr.bf16.mxu1 %v2802_v9 }
  0xc6   : > { %2527 = vmatpush3.bf16.msra.mxu0 %v2802_v9  ;;  %2671 = vmatpush3.bf16.msra.mxu1 %v2802_v9 }
  0xc7   : > { %2560 = vmatprep.subr.bf16.mxu1 %v2807_v10  ;;  %2608 = vmatprep.subr.bf16.mxu0 %v2808_v12 }
  0xc9   : > { %2529 = vmatmul.mubr.bf16.vlgmr.msra.gmra.mrb[0].mxu0 %v3434_v11  ;;  %2545 = vmatmul.mubr.bf16.vlgmr.msra.gmra.mrb[0].mxu1 %v3437_v13 }
  0xca   : > { %2561 = vmatpush3.bf16.msra.mxu1 %v2807_v10  ;;  %2609 = vmatpush3.bf16.msra.mxu0 %v2808_v12 }
  0xcb   : > { %2562 = vmatprep.subr.bf16.mxu1 %v2809_v14  ;;  %2610 = vmatprep.subr.bf16.mxu0 %v2810_v15 }
  0xcc   : > { %2532 = vmatprep.mubr.bf16.mxu0 %v3440_v16  ;;  %2548 = vmatprep.mubr.bf16.mxu1 %v3443_v17 }
  0xce   : > { %2563 = vmatpush3.bf16.msra.mxu1 %v2809_v14  ;;  %2611 = vmatpush3.bf16.msra.mxu0 %v2810_v15 }
  0xcf   : > { %2564 = vmatprep.subr.bf16.mxu1 %v2815_v18  ;;  %2612 = vmatprep.subr.bf16.mxu0 %v2816_v19 }
  0xd1   : > { %2533 = vmatmul.mubr.bf16.gmra.mrb[4].mxu0 %v2813_v20  ;;  %2549 = vmatmul.mubr.bf16.gmra.mrb[4].mxu1 %v3451_v21 }
  0xd2   : > { %2565 = vmatpush3.bf16.msra.mxu1 %v2815_v18  ;;  %2613 = vmatpush3.bf16.msra.mxu0 %v2816_v19 }
  0xd3   : > { %2566 = vmatprep.subr.bf16.mxu1 %v2817_v22  ;;  %2614 = vmatprep.subr.bf16.mxu0 %v2818_v23 }
  0xd4   : > { %2536 = vmatprep.mubr.bf16.mxu0 %v2819_v24  ;;  %2552 = vmatprep.mubr.bf16.mxu1 %v3455_v25 }
  0xd6   : > { %2567 = vmatpush3.bf16.msra.mxu1 %v2817_v22  ;;  %2615 = vmatpush3.bf16.msra.mxu0 %v2818_v23 }
  0xd7   : > { %2568 = vmatprep.subr.bf16.mxu1 %v2823_v26  ;;  %2616 = vmatprep.subr.bf16.mxu0 %v2824_v27 }
  0xd9   : > { %2537 = vmatmul.mubr.bf16.gmra.mrb[8].mxu0 %v2821_v28  ;;  %2553 = vmatmul.mubr.bf16.gmra.mrb[8].mxu1 %v2822_v29 }
  0xda   : > { %2569 = vmatpush3.bf16.msra.mxu1 %v2823_v26  ;;  %2617 = vmatpush3.bf16.msra.mxu0 %v2824_v27 }
  0xdb   : > { %2570 = vmatprep.subr.bf16.mxu1 %v2825_v30  ;;  %2618 = vmatprep.subr.bf16.mxu0 %v2826_v31 }
  0xdc   : > { %2540 = vmatprep.mubr.bf16.mxu0 %v2827_v32  ;;  %2556 = vmatprep.mubr.bf16.mxu1 %v2828_v33 }
  0xde   : > { %2571 = vmatpush3.bf16.msra.mxu1 %v2825_v30  ;;  %2619 = vmatpush3.bf16.msra.mxu0 %v2826_v31 }
  0xdf   : > { %2572 = vmatprep.subr.bf16.mxu1 %v2831_v34  ;;  %2620 = vmatprep.subr.bf16.mxu0 %v2832_v35 }
  0xe1   : > { %2541 = vmatmul.mubr.bf16.gmra.mrb[12].mxu0 %v2829_v36  ;;  %2557 = vmatmul.mubr.bf16.gmra.mrb[12].mxu1 %v2830_v37 }
  0xe2   : > { %2573 = vmatpush3.bf16.msra.mxu1 %v2831_v34  ;;  %2621 = vmatpush3.bf16.msra.mxu0 %v2832_v35 }
  0xe3   : > { %2574 = vmatprep.subr.bf16.mxu1 %v2833_v38  ;;  %2622 = vmatprep.subr.bf16.mxu0 %v2834_v39 }
  0xe4   : > { %2576 = vmatprep.mubr.bf16.mxu1 %v3426_v4  ;;  %2624 = vmatprep.mubr.bf16.mxu0 %v3426_v4 }
  0xe6   : > { %2575 = vmatpush3.bf16.msra.mxu1 %v2833_v38  ;;  %2623 = vmatpush3.bf16.msra.mxu0 %v2834_v39 }
  0xe9   : > { %2577 = vmatmul.mubr.bf16.vlgmr.msra.gmra.mrb[16].mxu1 %v3434_v11  ;;  %2625 = vmatmul.mubr.bf16.vlgmr.msra.gmra.mrb[16].mxu0 %v3434_v11 }
  0xea   : > { %2580 = vmatprep.mubr.bf16.mxu1 %v3440_v16  ;;  %2628 = vmatprep.mubr.bf16.mxu0 %v3440_v16 }
  0xf1   : > { %2581 = vmatmul.mubr.bf16.gmra.mrb[20].mxu1 %v2813_v20  ;;  %2629 = vmatmul.mubr.bf16.gmra.mrb[20].mxu0 %v2813_v20 }
  0xf2   : > { %2584 = vmatprep.mubr.bf16.mxu1 %v2819_v24  ;;  %2632 = vmatprep.mubr.bf16.mxu0 %v2819_v24 }
  0xf9   : > { %2585 = vmatmul.mubr.bf16.gmra.mrb[24].mxu1 %v2821_v28  ;;  %2633 = vmatmul.mubr.bf16.gmra.mrb[24].mxu0 %v2821_v28 }
  0xfa   : > { %2588 = vmatprep.mubr.bf16.mxu1 %v2827_v32  ;;  %2636 = vmatprep.mubr.bf16.mxu0 %v2827_v32 }
 0x101   : > { %2589 = vmatmul.mubr.bf16.gmra.mrb[28].mxu1 %v2829_v36  ;;  %2637 = vmatmul.mubr.bf16.gmra.mrb[28].mxu0 %v2829_v36 }
 0x102   : > { %2592 = vmatprep.mubr.bf16.mxu1 %v3429_v5  ;;  %2640 = vmatprep.mubr.bf16.mxu0 %v3429_v5 }
 0x109   : > { %2593 = vmatmul.mubr.bf16.gmra.mrb[32].mxu1 %v3437_v13  ;;  %2641 = vmatmul.mubr.bf16.gmra.mrb[32].mxu0 %v3437_v13 }
 0x10a   : > { %2596 = vmatprep.mubr.bf16.mxu1 %v3443_v17  ;;  %2644 = vmatprep.mubr.bf16.mxu0 %v3443_v17 }
 0x111   : > { %2597 = vmatmul.mubr.bf16.gmra.mrb[36].mxu1 %v3451_v21  ;;  %2645 = vmatmul.mubr.bf16.gmra.mrb[36].mxu0 %v3451_v21 }
 0x112   : > { %2600 = vmatprep.mubr.bf16.mxu1 %v3455_v25  ;;  %2648 = vmatprep.mubr.bf16.mxu0 %v3455_v25 }
 0x119   : > { %2601 = vmatmul.mubr.bf16.gmra.mrb[40].mxu1 %v2822_v29  ;;  %2649 = vmatmul.mubr.bf16.gmra.mrb[40].mxu0 %v2822_v29 }
 0x11a   : > { %2604 = vmatprep.mubr.bf16.mxu1 %v2828_v33  ;;  %2652 = vmatprep.mubr.bf16.mxu0 %v2828_v33 }
 0x121   : > { %2605 = vmatmul.mubr.bf16.gmra.mrb[44].mxu1 %v2830_v37  ;;  %2653 = vmatmul.mubr.bf16.gmra.mrb[44].mxu0 %v2830_v37 }
 0x19c   : > { %v2530_v40 = vpop.f32.mrb[0].mxu0  ;;  %v2546_v41 = vpop.f32.mrb[0].mxu1 }
 0x19d   : > { %v585_v42 = vpop.f32.mrb[1].mxu0  ;;  %v649_v43 = vpop.f32.mrb[1].mxu1 }
 0x19e   : > { %v2531_v44 = vpop.f32.mrb[2].mxu0  ;;  %v2547_v45 = vpop.f32.mrb[2].mxu1 }
 0x19f   : > { %v2163_v46 = vpack.c.bf16 %v2531_v44, %v2530_v40  ;;  %v2203_v47 = vpack.c.bf16 %v2547_v45, %v2546_v41  ;;  %v588_v48 = vpop.f32.mrb[3].mxu0  ;;  %v652_v49 = vpop.f32.mrb[3].mxu1 }
 0x1a0   : > { %v2158_v50 = vpack.c.bf16 %v588_v48, %v585_v42  ;;  %v2198_v51 = vpack.c.bf16 %v652_v49, %v649_v43 }
 0x1a1   : > { %2395 = vst [vmem:[%s3482_s7 + $0x8] sm:$0xff] %v2163_v46   ;;  %2403 = vst [vmem:[%s3482_s7 + $0x48] sm:$0xff] %v2203_v47  }
 0x1a2   : > { %2159 = vst [vmem:[%s3482_s7] sm:$0xff] %v2158_v50   ;;  %2402 = vst [vmem:[%s3482_s7 + $0x40] sm:$0xff] %v2198_v51  }
 0x1a4   : > { %v2534_v52 = vpop.f32.mrb[4].mxu0  ;;  %v2550_v53 = vpop.f32.mrb[4].mxu1 }
 0x1a5   : > { %v601_v54 = vpop.f32.mrb[5].mxu0  ;;  %v665_v55 = vpop.f32.mrb[5].mxu1 }
 0x1a6   : > { %v2535_v56 = vpop.f32.mrb[6].mxu0  ;;  %v2551_v57 = vpop.f32.mrb[6].mxu1 }
 0x1a7   : > { %v2173_v58 = vpack.c.bf16 %v2535_v56, %v2534_v52  ;;  %v2213_v59 = vpack.c.bf16 %v2551_v57, %v2550_v53  ;;  %v604_v60 = vpop.f32.mrb[7].mxu0  ;;  %v668_v61 = vpop.f32.mrb[7].mxu1 }
 0x1a8   : > { %v2168_v62 = vpack.c.bf16 %v604_v60, %v601_v54  ;;  %v2208_v63 = vpack.c.bf16 %v668_v61, %v665_v55 }
 0x1a9   : > { %2397 = vst [vmem:[%s3482_s7 + $0x18] sm:$0xff] %v2173_v58   ;;  %2405 = vst [vmem:[%s3482_s7 + $0x58] sm:$0xff] %v2213_v59  }
 0x1aa   : > { %2396 = vst [vmem:[%s3482_s7 + $0x10] sm:$0xff] %v2168_v62   ;;  %2404 = vst [vmem:[%s3482_s7 + $0x50] sm:$0xff] %v2208_v63  }
 0x1ac   : > { %v2538_v0 = vpop.f32.mrb[8].mxu0  ;;  %v2554_v1 = vpop.f32.mrb[8].mxu1 }
 0x1ad   : > { %v617_v2 = vpop.f32.mrb[9].mxu0  ;;  %v681_v3 = vpop.f32.mrb[9].mxu1 }
 0x1ae   : > { %v2539_v4 = vpop.f32.mrb[10].mxu0  ;;  %v2555_v5 = vpop.f32.mrb[10].mxu1 }
 0x1af   : > { %v2183_v6 = vpack.c.bf16 %v2539_v4, %v2538_v0  ;;  %v2223_v7 = vpack.c.bf16 %v2555_v5, %v2554_v1  ;;  %v620_v8 = vpop.f32.mrb[11].mxu0  ;;  %v684_v9 = vpop.f32.mrb[11].mxu1 }
 0x1b0   : > { %v2178_v10 = vpack.c.bf16 %v620_v8, %v617_v2  ;;  %v2218_v11 = vpack.c.bf16 %v684_v9, %v681_v3 }
 0x1b1   : > { %2399 = vst [vmem:[%s3482_s7 + $0x28] sm:$0xff] %v2183_v6   ;;  %2407 = vst [vmem:[%s3482_s7 + $0x68] sm:$0xff] %v2223_v7  }
 0x1b2   : > { %2398 = vst [vmem:[%s3482_s7 + $0x20] sm:$0xff] %v2178_v10   ;;  %2406 = vst [vmem:[%s3482_s7 + $0x60] sm:$0xff] %v2218_v11  }
 0x1b4   : > { %v2542_v12 = vpop.f32.mrb[12].mxu0  ;;  %v2558_v13 = vpop.f32.mrb[12].mxu1 }
 0x1b5   : > { %v633_v14 = vpop.f32.mrb[13].mxu0  ;;  %v697_v15 = vpop.f32.mrb[13].mxu1 }
 0x1b6   : > { %v2543_v16 = vpop.f32.mrb[14].mxu0  ;;  %v2559_v17 = vpop.f32.mrb[14].mxu1 }
 0x1b7   : > { %v2193_v18 = vpack.c.bf16 %v2543_v16, %v2542_v12  ;;  %v2233_v19 = vpack.c.bf16 %v2559_v17, %v2558_v13  ;;  %v636_v20 = vpop.f32.mrb[15].mxu0  ;;  %v700_v21 = vpop.f32.mrb[15].mxu1 }
 0x1b8   : > { %v2188_v22 = vpack.c.bf16 %v636_v20, %v633_v14  ;;  %v2228_v23 = vpack.c.bf16 %v700_v21, %v697_v15 }
 0x1b9   : > { %2401 = vst [vmem:[%s3482_s7 + $0x38] sm:$0xff] %v2193_v18   ;;  %2409 = vst [vmem:[%s3482_s7 + $0x78] sm:$0xff] %v2233_v19  }
 0x1ba   : > { %2400 = vst [vmem:[%s3482_s7 + $0x30] sm:$0xff] %v2188_v22   ;;  %2408 = vst [vmem:[%s3482_s7 + $0x70] sm:$0xff] %v2228_v23  }
 0x1bb   : > { %2962 = shalt.err (!%p2959_p12)
}
 0x1bc   : > { %s2963_s11 = scalar_lea.hbm %s3505_s1, 2048  ;;  %s2967_s3 = scalar_lea.hbm %s3683_s4, 8192 }
 0x1bd   : > { %p2964_p13 = scmp.ne.s32.totalorder %s3505_s1, %s2963_s11  ;;  %p2968_p6 = scmp.lt.u32.totalorder %s3505_s1, %s3683_s4 }
 0x1be   : > { %p2969_p0 = scmp.lt.u32.totalorder %s2967_s3, %s2963_s11  ;;  %p2971_p5 = scmp.lt.u32.totalorder %s2963_s11, %s3505_s1 }
 0x1bf   : > { %p2965_p2 = pnand %p2964_p13, %p3336_p3 }
 0x1c0   : > { %p2970_p10 = por %p2969_p0, %p2968_p6 }
 0x1c1   : > { %p2966_p9 = pneg %p2965_p2 }
 0x1c2   : > { %p2972_p7 = por %p2971_p5, %p2970_p10 }
 0x1c4   : > { %p2973_p11 = pnand %p2972_p7, %p2966_p9 }
 0x1c6   : > { %2976 = shalt.err (!%p2973_p11)
}
 0x1c7   : > { %s3124_s5 = smov 64   ;;  %s3125_s21 = smov 4   ;;  %v2578_v24 = vpop.f32.mrb[16].mxu1  ;;  %v2626_v25 = vpop.f32.mrb[16].mxu0 }
 0x1c8   : > { %2686 = dma.vmem_to_hbm [thread:$0]  (%p3336_p3), %s3507_s24, 2048, %s3505_s1, %s1643_s10, %s3124_s5, %s3124_s5, %s3125_s21   ;;  %v970_v26 = vpop.f32.mrb[17].mxu1  ;;  %v1355_v27 = vpop.f32.mrb[17].mxu0 }
 0x1c9   : > { %v2579_v28 = vpop.f32.mrb[18].mxu1  ;;  %v2627_v29 = vpop.f32.mrb[18].mxu0  ;;  %s3541_s25 = scalar_lea.vmem [#allocation11], %s3407_s16  ;;  %s3545_s19 = scalar_lea.vmem [#allocation13], %s3407_s16 }
 0x1ca   : > { %v2243_v30 = vpack.c.bf16 %v2579_v28, %v2578_v24  ;;  %v2323_v31 = vpack.c.bf16 %v2627_v29, %v2626_v25  ;;  %v973_v32 = vpop.f32.mrb[19].mxu1  ;;  %v1358_v33 = vpop.f32.mrb[19].mxu0  ;;  %s1647_s16 = sand.u32 1, %s3204_s29   ;;  %s1686_s24 = sshll.u32 %s3541_s25, 4  ;;  %s3583_s24 = int_to_ptr.vmem [resolvable:$true] %s1686_s24 }
 0x1cb   : > { %v2238_v34 = vpack.c.bf16 %v973_v32, %v970_v26  ;;  %v2318_v35 = vpack.c.bf16 %v1358_v33, %v1355_v27  ;;  %v2582_v36 = vpop.f32.mrb[20].mxu1  ;;  %v2630_v37 = vpop.f32.mrb[20].mxu0  ;;  %s1704_s12 = sshll.u32 %s3545_s19, 4  ;;  %s3725_s29 = sld [smem:[#allocation25_spill]]  ;;  %s3593_s12 = int_to_ptr.vmem [resolvable:$true] %s1704_s12 }
 0x1cc   : > { %2410 = vst [vmem:[%s3541_s25 + $0x8] sm:$0xff] %v2243_v30   ;;  %2425 = vst [vmem:[%s3545_s19 + $0x8] sm:$0xff] %v2323_v31   ;;  %v986_v38 = vpop.f32.mrb[21].mxu1  ;;  %v1371_v39 = vpop.f32.mrb[21].mxu0  ;;  %s3726_s17 = sld [smem:[#allocation26_spill]]  ;;  %s3597_s14 = scalar_lea.sflag [#allocation12], %s1647_s16 }
 0x1cd   : > { %2239 = vst [vmem:[%s3541_s25] sm:$0xff] %v2238_v34   ;;  %2319 = vst [vmem:[%s3545_s19] sm:$0xff] %v2318_v35   ;;  %v2583_v40 = vpop.f32.mrb[22].mxu1  ;;  %v2631_v41 = vpop.f32.mrb[22].mxu0  ;;  %s2977_s2 = scalar_lea.vmem %s3583_s24, 2048  ;;  %s3126_s3 = smov [#allocation11]  }
 0x1ce   : > { %v2253_v42 = vpack.c.bf16 %v2583_v40, %v2582_v36  ;;  %v2333_v43 = vpack.c.bf16 %v2631_v41, %v2630_v37  ;;  %v989_v44 = vpop.f32.mrb[23].mxu1  ;;  %v1374_v45 = vpop.f32.mrb[23].mxu0  ;;  %p2978_p1 = scmp.ne.s32.totalorder %s3583_s24, %s2977_s2  ;;  %s2981_s7 = sshll.u32 %s3126_s3, 4  ;;  %s2982_s7 = int_to_ptr.vmem [resolvable:$false] %s2981_s7 }
 0x1cf   : > { %v2248_v46 = vpack.c.bf16 %v989_v44, %v986_v38  ;;  %v2328_v47 = vpack.c.bf16 %v1374_v45, %v1371_v39  ;;  %v2586_v48 = vpop.f32.mrb[24].mxu1  ;;  %v2634_v49 = vpop.f32.mrb[24].mxu0  ;;  %s2983_s9 = scalar_lea.vmem %s2982_s7, 4096  ;;  %p2984_p12 = scmp.lt.s32.totalorder %s3583_s24, %s2982_s7 }
 0x1d0   : > { %2412 = vst [vmem:[%s3541_s25 + $0x18] sm:$0xff] %v2253_v42   ;;  %2427 = vst [vmem:[%s3545_s19 + $0x18] sm:$0xff] %v2333_v43   ;;  %v1002_v50 = vpop.f32.mrb[25].mxu1  ;;  %v1387_v51 = vpop.f32.mrb[25].mxu0  ;;  %p2979_p4 = pnand %p2978_p1, %p3336_p3  ;;  %p2985_p13 = scmp.lt.s32.totalorder %s2983_s9, %s2977_s2 }
 0x1d1   : > { %2411 = vst [vmem:[%s3541_s25 + $0x10] sm:$0xff] %v2248_v46   ;;  %2426 = vst [vmem:[%s3545_s19 + $0x10] sm:$0xff] %v2328_v47   ;;  %v2587_v52 = vpop.f32.mrb[26].mxu1  ;;  %v2635_v53 = vpop.f32.mrb[26].mxu0  ;;  %s3581_s20 = scalar_lea.hbm %s3725_s29, %s3498_s6 }
 0x1d2   : > { %v2263_v54 = vpack.c.bf16 %v2587_v52, %v2586_v48  ;;  %v2343_v55 = vpack.c.bf16 %v2635_v53, %v2634_v49  ;;  %v1005_v56 = vpop.f32.mrb[27].mxu1  ;;  %v1390_v57 = vpop.f32.mrb[27].mxu0  ;;  %s3591_s11 = scalar_lea.hbm %s3726_s17, %s3498_s6  ;;  %p2980_p8 = pneg %p2979_p4 }
 0x1d3   : > { %v2258_v58 = vpack.c.bf16 %v1005_v56, %v1002_v50  ;;  %v2338_v59 = vpack.c.bf16 %v1390_v57, %v1387_v51  ;;  %p2986_p2 = por %p2985_p13, %p2984_p12 }
 0x1d4   : > { %2414 = vst [vmem:[%s3541_s25 + $0x28] sm:$0xff] %v2263_v54   ;;  %2429 = vst [vmem:[%s3545_s19 + $0x28] sm:$0xff] %v2343_v55   ;;  %v2590_v60 = vpop.f32.mrb[28].mxu1  ;;  %v2638_v61 = vpop.f32.mrb[28].mxu0 }
 0x1d5   : > { %2413 = vst [vmem:[%s3541_s25 + $0x20] sm:$0xff] %v2258_v58   ;;  %2428 = vst [vmem:[%s3545_s19 + $0x20] sm:$0xff] %v2338_v59   ;;  %v1018_v62 = vpop.f32.mrb[29].mxu1  ;;  %v1403_v63 = vpop.f32.mrb[29].mxu0  ;;  %p2987_p9 = pnand %p2986_p2, %p2980_p8 }
 0x1d6   : > { %v2591_v0 = vpop.f32.mrb[30].mxu1  ;;  %v2639_v1 = vpop.f32.mrb[30].mxu0 }
 0x1d7   : > { %v2273_v2 = vpack.c.bf16 %v2591_v0, %v2590_v60  ;;  %v2353_v3 = vpack.c.bf16 %v2639_v1, %v2638_v61  ;;  %v1021_v4 = vpop.f32.mrb[31].mxu1  ;;  %v1406_v5 = vpop.f32.mrb[31].mxu0 }
 0x1d8   : > { %v2268_v6 = vpack.c.bf16 %v1021_v4, %v1018_v62  ;;  %v2348_v7 = vpack.c.bf16 %v1406_v5, %v1403_v63 }
 0x1d9   : > { %2416 = vst [vmem:[%s3541_s25 + $0x38] sm:$0xff] %v2273_v2   ;;  %2431 = vst [vmem:[%s3545_s19 + $0x38] sm:$0xff] %v2353_v3  }
 0x1da   : > { %2415 = vst [vmem:[%s3541_s25 + $0x30] sm:$0xff] %v2268_v6   ;;  %2430 = vst [vmem:[%s3545_s19 + $0x30] sm:$0xff] %v2348_v7  }
 0x1dc   : > { %v2594_v8 = vpop.f32.mrb[32].mxu1  ;;  %v2642_v9 = vpop.f32.mrb[32].mxu0 }
 0x1dd   : > { %v1034_v10 = vpop.f32.mrb[33].mxu1  ;;  %v1419_v11 = vpop.f32.mrb[33].mxu0 }
 0x1de   : > { %v2595_v12 = vpop.f32.mrb[34].mxu1  ;;  %v2643_v13 = vpop.f32.mrb[34].mxu0 }
 0x1df   : > { %v2283_v14 = vpack.c.bf16 %v2595_v12, %v2594_v8  ;;  %v2363_v15 = vpack.c.bf16 %v2643_v13, %v2642_v9  ;;  %v1037_v16 = vpop.f32.mrb[35].mxu1  ;;  %v1422_v17 = vpop.f32.mrb[35].mxu0 }
 0x1e0   : > { %v2278_v18 = vpack.c.bf16 %v1037_v16, %v1034_v10  ;;  %v2358_v19 = vpack.c.bf16 %v1422_v17, %v1419_v11 }
 0x1e1   : > { %2418 = vst [vmem:[%s3541_s25 + $0x48] sm:$0xff] %v2283_v14   ;;  %2433 = vst [vmem:[%s3545_s19 + $0x48] sm:$0xff] %v2363_v15  }
 0x1e2   : > { %2417 = vst [vmem:[%s3541_s25 + $0x40] sm:$0xff] %v2278_v18   ;;  %2432 = vst [vmem:[%s3545_s19 + $0x40] sm:$0xff] %v2358_v19  }
 0x1e4   : > { %v2598_v20 = vpop.f32.mrb[36].mxu1  ;;  %v2646_v21 = vpop.f32.mrb[36].mxu0 }
 0x1e5   : > { %v1050_v22 = vpop.f32.mrb[37].mxu1  ;;  %v1435_v23 = vpop.f32.mrb[37].mxu0 }
 0x1e6   : > { %v2599_v24 = vpop.f32.mrb[38].mxu1  ;;  %v2647_v25 = vpop.f32.mrb[38].mxu0 }
 0x1e7   : > { %v2293_v26 = vpack.c.bf16 %v2599_v24, %v2598_v20  ;;  %v2373_v27 = vpack.c.bf16 %v2647_v25, %v2646_v21  ;;  %v1053_v28 = vpop.f32.mrb[39].mxu1  ;;  %v1438_v29 = vpop.f32.mrb[39].mxu0 }
 0x1e8   : > { %v2288_v30 = vpack.c.bf16 %v1053_v28, %v1050_v22  ;;  %v2368_v31 = vpack.c.bf16 %v1438_v29, %v1435_v23 }
 0x1e9   : > { %2420 = vst [vmem:[%s3541_s25 + $0x58] sm:$0xff] %v2293_v26   ;;  %2435 = vst [vmem:[%s3545_s19 + $0x58] sm:$0xff] %v2373_v27  }
 0x1ea   : > { %2419 = vst [vmem:[%s3541_s25 + $0x50] sm:$0xff] %v2288_v30   ;;  %2434 = vst [vmem:[%s3545_s19 + $0x50] sm:$0xff] %v2368_v31  }
 0x1ec   : > { %v2602_v32 = vpop.f32.mrb[40].mxu1  ;;  %v2650_v33 = vpop.f32.mrb[40].mxu0 }
 0x1ed   : > { %v1066_v34 = vpop.f32.mrb[41].mxu1  ;;  %v1451_v35 = vpop.f32.mrb[41].mxu0 }
 0x1ee   : > { %v2603_v36 = vpop.f32.mrb[42].mxu1  ;;  %v2651_v37 = vpop.f32.mrb[42].mxu0 }
 0x1ef   : > { %v2303_v38 = vpack.c.bf16 %v2603_v36, %v2602_v32  ;;  %v2383_v39 = vpack.c.bf16 %v2651_v37, %v2650_v33  ;;  %v1069_v40 = vpop.f32.mrb[43].mxu1  ;;  %v1454_v41 = vpop.f32.mrb[43].mxu0 }
 0x1f0   : > { %v2298_v42 = vpack.c.bf16 %v1069_v40, %v1066_v34  ;;  %v2378_v43 = vpack.c.bf16 %v1454_v41, %v1451_v35 }
 0x1f1   : > { %2422 = vst [vmem:[%s3541_s25 + $0x68] sm:$0xff] %v2303_v38   ;;  %2437 = vst [vmem:[%s3545_s19 + $0x68] sm:$0xff] %v2383_v39  }
 0x1f2   : > { %2421 = vst [vmem:[%s3541_s25 + $0x60] sm:$0xff] %v2298_v42   ;;  %2436 = vst [vmem:[%s3545_s19 + $0x60] sm:$0xff] %v2378_v43  }
 0x1f4   : > { %v2606_v44 = vpop.f32.mrb[44].mxu1  ;;  %v2654_v45 = vpop.f32.mrb[44].mxu0 }
 0x1f5   : > { %v1082_v46 = vpop.f32.mrb[45].mxu1  ;;  %v1467_v47 = vpop.f32.mrb[45].mxu0 }
 0x1f6   : > { %v2607_v48 = vpop.f32.mrb[46].mxu1  ;;  %v2655_v49 = vpop.f32.mrb[46].mxu0 }
 0x1f7   : > { %v2313_v50 = vpack.c.bf16 %v2607_v48, %v2606_v44  ;;  %v2393_v51 = vpack.c.bf16 %v2655_v49, %v2654_v45  ;;  %v1085_v52 = vpop.f32.mrb[47].mxu1  ;;  %v1470_v53 = vpop.f32.mrb[47].mxu0 }
 0x1f8   : > { %v2308_v54 = vpack.c.bf16 %v1085_v52, %v1082_v46  ;;  %v2388_v55 = vpack.c.bf16 %v1470_v53, %v1467_v47 }
 0x1f9   : > { %2424 = vst [vmem:[%s3541_s25 + $0x78] sm:$0xff] %v2313_v50   ;;  %2439 = vst [vmem:[%s3545_s19 + $0x78] sm:$0xff] %v2393_v51  }
 0x1fa   : > { %2423 = vst [vmem:[%s3541_s25 + $0x70] sm:$0xff] %v2308_v54   ;;  %2438 = vst [vmem:[%s3545_s19 + $0x70] sm:$0xff] %v2388_v55  }
 0x1fb   : > { %2990 = shalt.err (!%p2987_p9)
}
 0x1fc   : > { %s2991_s6 = scalar_lea.hbm %s3581_s20, 2048  ;;  %s2995_s16 = scalar_lea.hbm %s3725_s29, 8192 }
 0x1fd   : > { %p2992_p6 = scmp.ne.s32.totalorder %s3581_s20, %s2991_s6  ;;  %p2996_p5 = scmp.lt.u32.totalorder %s3581_s20, %s3725_s29 }
 0x1fe   : > { %p2997_p7 = scmp.lt.u32.totalorder %s2995_s16, %s2991_s6  ;;  %p2999_p1 = scmp.lt.u32.totalorder %s2991_s6, %s3581_s20 }
 0x1ff   : > { %p2993_p0 = pnand %p2992_p6, %p3336_p3 }
 0x200   : > { %p2998_p11 = por %p2997_p7, %p2996_p5 }
 0x201   : > { %p2994_p10 = pneg %p2993_p0 }
 0x202   : > { %p3000_p4 = por %p2999_p1, %p2998_p11 }
 0x204   : > { %p3001_p8 = pnand %p3000_p4, %p2994_p10 }
 0x206   : > { %3004 = shalt.err (!%p3001_p8)
}
 0x207   : > { %2687 = dma.vmem_to_hbm [thread:$0]  (%p3336_p3), %s3583_s24, 2048, %s3581_s20, %s3597_s14, %s3124_s5, %s3124_s5, %s3125_s21  }
 0x208   : > { %s3005_s13 = scalar_lea.vmem %s3593_s12, 2048  ;;  %s3127_s15 = smov [#allocation13]  }
 0x209   : > { %p3006_p12 = scmp.ne.s32.totalorder %s3593_s12, %s3005_s13  ;;  %s3009_s2 = sshll.u32 %s3127_s15, 4  ;;  %s3010_s2 = int_to_ptr.vmem [resolvable:$false] %s3009_s2 }
 0x20a   : > { %s3011_s3 = scalar_lea.vmem %s3010_s2, 4096  ;;  %p3012_p9 = scmp.lt.s32.totalorder %s3593_s12, %s3010_s2 }
 0x20b   : > { %p3007_p13 = pnand %p3006_p12, %p3336_p3  ;;  %p3013_p6 = scmp.lt.s32.totalorder %s3011_s3, %s3005_s13 }
 0x20d   : > { %p3008_p2 = pneg %p3007_p13  ;;  %p3014_p0 = por %p3013_p6, %p3012_p9 }
 0x20f   : > { %p3015_p10 = pnand %p3014_p0, %p3008_p2 }
 0x211   : > { %3018 = shalt.err (!%p3015_p10)
}
 0x212   : > { %s3019_s24 = scalar_lea.hbm %s3591_s11, 2048  ;;  %s3023_s9 = scalar_lea.hbm %s3726_s17, 8192 }
 0x213   : > { %p3020_p5 = scmp.ne.s32.totalorder %s3591_s11, %s3019_s24  ;;  %p3024_p1 = scmp.lt.u32.totalorder %s3591_s11, %s3726_s17 }
 0x214   : > { %p3025_p4 = scmp.lt.u32.totalorder %s3023_s9, %s3019_s24  ;;  %p3027_p12 = scmp.lt.u32.totalorder %s3019_s24, %s3591_s11 }
 0x215   : > { %p3021_p7 = pnand %p3020_p5, %p3336_p3 }
 0x216   : > { %p3026_p8 = por %p3025_p4, %p3024_p1 }
 0x217   : > { %p3022_p11 = pneg %p3021_p7 }
 0x218   : > { %p3028_p13 = por %p3027_p12, %p3026_p8 }
 0x21a   : > { %p3029_p2 = pnand %p3028_p13, %p3022_p11 }
 0x21c   : > { %3032 = shalt.err (!%p3029_p2)
}
 0x21d   : > { %2688 = dma.vmem_to_hbm [thread:$0]  (%p3336_p3), %s3593_s12, 2048, %s3591_s11, %s3597_s14, %s3124_s5, %s3124_s5, %s3125_s21  }
 0x21e PF: > { %s3727_s19 = sld [smem:[#allocation19_spill]]  ;;  %s3728_s16 = sld [smem:[#allocation20_spill]] }
 0x21f   : > { %p2723_p9 = scmp.ge.s32.totalorder %s3115_s28, 2 }
 0x224   : > { %s1719_s1 = sand.u32 1, %s3727_s19   ;;  %p3729_p6 = scmp.ne.s32.totalorder %s3728_s16, 0 }
 0x225   : > { %s1720_s10 = scalar_lea.sflag [#allocation4], %s1719_s1 }
 0x226   : > { %p2707_p0 = pnand %p2723_p9, %p3729_p6 }
 0x228   : > { %3078 = dma.done.wait (!%p2707_p0), %s1720_s10, 2048  }
 0x229   : > { %3080 = vsyncadd (!%p2707_p0), %s1720_s10, 4294965248  ;;  %s3730_s8 = sadd.s32 4294967294, %s3115_s28  }
 0x22a   : > { %s1728_s13 = sand.u32 1, %s3730_s8  }
 0x22b   : > { %s1729_s15 = scalar_lea.sflag [#allocation12], %s1728_s13 }
 0x22c   : > { %3082 = dma.done.wait (!%p2707_p0), %s1729_s15, 4096  }
 0x22d   : > { %3084 = vsyncadd (!%p2707_p0), %s1729_s15, 4294963200  ;;  %s28_s28 = sadd.s32 1, %s3115_s28   ;;  %s3731_s5 = sld [smem:[#allocation21_spill]] }
 0x22e   : > { %p25_p3 = scmp.ge.s32.totalorder %s28_s28, 6   ;;  %s3732_s21 = smov %s3091_s22 }
 0x22f   : > { %s3733_s22 = smov %s3095_s23  ;;  %s3734_s23 = smov %s3353_s18 }
 0x230   : > { %s3735_s24 = smov %s3107_s26  ;;  %s3736_s25 = smov %s3111_s27 }
 0x231   : > { %s3737_s26 = smov %s3740_s30  ;;  %27 = sbr.rel (!%p25_p3) target bundleno = 17 (0x11), region = 125 }
 0x233   : > { %s3738_s27 = smov %s3731_s5 }
 0x238   :  { %1743 = vsyncpa [#allocation3], 1 }
 0x239   :  { %1745 = vsyncpa [#allocation3 + $0x1], 1 }
 0x23a   :  { %1746 = vsyncpa [#allocation6], 1 }
 0x23b   :  { %1747 = vsyncpa [#allocation9], 1 }
 0x23c   :  { %1748 = vsyncpa [#allocation4], 1 }
 0x23d   :  { %1750 = vsyncpa [#allocation4 + $0x1], 1 }
 0x23e   :  { %1751 = vsyncpa [#allocation12], 1 }
 0x23f   :  { %1753 = vsyncpa [#allocation12 + $0x1], 1 }

</bundles_post_ra>
